<compile_context>
chip_gen: v7x
topology: tpu7x:2x2x1
jax: 0.10.0
libtpu: 0.0.40
codegen_flags: <defaults>
</compile_context>

<pallas_src>
import functools

import jax
import jax.numpy as jnp
from jax import lax
from jax.experimental import pallas as pl
from jax.experimental.pallas import tpu as pltpu


def _round_up(x, m):
    return ((x + m - 1) // m) * m


def _tpu_generation():
    """Best-effort TPU generation (5/6/7), 0 if unknown."""
    try:
        kind = jax.devices()[0].device_kind.lower()
    except Exception:
        return 0
    for g in (7, 6, 5):
        if f"v{g}" in kind:
            return g
    return 0


def _vmem_budget_bytes(block_b, chunk_b, m, in_itemsize):
    """Padded VMEM footprint estimate (lane dim pads to 128)."""
    lane = 128
    padded_row = m * lane                                   # elems / batch row
    x_bytes = 2 * block_b * padded_row * in_itemsize        # double-buffered input block
    h_bytes = 2 * chunk_b * padded_row * 4                  # two live f32 intermediates / chunk
    out_bytes = 2 * block_b * lane * 4                      # double-buffered output block
    w_bytes = (2 * 128 * lane + 2 * 8 * lane) * 4           # resident weights + biases (generous)
    return x_bytes + h_bytes + out_bytes + w_bytes


def _map_point_mlp_kernel(x_ref, w1_ref, b1_ref, w2_ref, b2_ref, o_ref, *, chunk_b):
    # x_ref : (TB, M, D_in) block of TB batch elements
    # w1_ref: (D_in, E), b1_ref: (1, E), w2_ref: (E, E), b2_ref: (1, E)
    # o_ref : (TB, E)
    tb, m, d_in = x_ref.shape
    e = o_ref.shape[-1]
    w1 = w1_ref[...]
    b1 = b1_ref[...]
    w2 = w2_ref[...]
    b2 = b2_ref[...]

    def mlp_max(x_blk, nb):
        # (nb, M, D_in) -> (nb*M, D_in): leading-dim collapse (free when M % 8 == 0)
        x2 = x_blk.reshape(nb * m, d_in)
        h = jnp.dot(x2, w1, preferred_element_type=jnp.float32) + b1
        h = jnp.maximum(h, 0.0)
        h = jnp.dot(h.astype(w2.dtype), w2, preferred_element_type=jnp.float32) + b2
        h = jnp.maximum(h, 0.0)
        # torch.max(..., axis=1)[0] over the map-element axis
        return jnp.max(h.reshape(nb, m, e), axis=1)

    if chunk_b >= tb:
        # Small block: single pass.
        o_ref[...] = mlp_max(x_ref[...], tb).astype(o_ref.dtype)
    else:
        # Large block: bound the live f32 intermediates by looping over
        # sub-chunks of batch rows while keeping the big DMA block.
        n_chunks = tb // chunk_b  # exact by construction in the wrapper

        def body(c, carry):
            start = pl.multiple_of(c * chunk_b, chunk_b)
            res = mlp_max(x_ref[pl.ds(start, chunk_b)], chunk_b)
            o_ref[pl.ds(start, chunk_b), :] = res.astype(o_ref.dtype)
            return carry

        lax.fori_loop(0, n_chunks, body, 0, unroll=True)


def map_point_mlp_encoder(points, w1, b1, w2, b2, *, block_b=None, compute_dtype=None):
    """
    points: [B, M, P, dim]
    w1:     [P*dim, E], b1: [E]
    w2:     [E, E],     b2: [E]
    compute_dtype: e.g. jnp.bfloat16 to feed the MXU with bf16 operands
                   (accumulation / bias / relu / max stay in f32).
    returns (outputs [B, 1, E], additional_costs {})
    """
    B, M, P, dim = points.shape
    E = w1.shape[1]
    out_dtype = points.dtype
    gen = _tpu_generation()

    # Keep M a multiple of 8 so the (TB,M,D)->(TB*M,D) collapse and the
    # cross-sublane max stay relayout-free.  Edge-padding duplicates the last
    # map element, which leaves the per-batch max unchanged.  (Extra HBM pass
    # only for configs with M % 8 != 0; zero cost for the default M = 8.)
    if M % 8 != 0:
        pad_m = (-M) % 8
        points = jnp.pad(points, ((0, 0), (0, pad_m), (0, 0), (0, 0)), mode="edge")
        M = M + pad_m

    D_in = P * dim
    x = points.reshape(B, M, D_in)  # same rows as points.view(-1, P*dim)

    # Optional bf16 MXU-operand path (v6e/v7x): halves x HBM bytes.
    if compute_dtype is not None and jnp.dtype(compute_dtype) != x.dtype:
        x = x.astype(compute_dtype)
        w1c = w1.astype(compute_dtype)
        w2c = w2.astype(compute_dtype)
    else:
        w1c, w2c = w1, w2
    b1_2d = b1.reshape(1, E).astype(jnp.float32)
    b2_2d = b2.reshape(1, E).astype(jnp.float32)

    # ---- batch block selection (generation-aware) ----
    if block_b is None:
        # target MXU rows per grid step: ~4k on v5e (16 MiB default scoped
        # VMEM), ~8k on v6e/v7x (32 MiB default scoped VMEM).
        rows_target = 4096 if gen == 5 else 8192
        block_b = max(8, pl.cdiv(rows_target, max(M, 1)))
    if gen == 7:
        # v7x has 2 TensorCores: keep >= 2 grid steps so both get work.
        block_b = min(block_b, _round_up(pl.cdiv(B, 2), 8))
    if block_b >= B:
        block_b = B                          # one step: block == full batch dim
    else:
        block_b = _round_up(block_b, 8)      # sublane-dense output blocks
        if block_b >= B:
            block_b = B
    n_blocks = pl.cdiv(B, block_b)           # partial tail block handled by Pallas masking

    # ---- in-kernel sub-chunk (bounds live f32 intermediates) ----
    chunk_b = block_b
    chunk_target = max(8, (pl.cdiv(2048, max(M, 1)) // 8) * 8)  # ~2k MXU rows per chunk
    if block_b > chunk_target:
        for cand in range(chunk_target, 63, -8):                # exact divisor, >= 64
            if block_b % cand == 0:
                chunk_b = cand
                break

    # ---- VMEM budget (lane padding included) -> vmem_limit_bytes ----
    in_itemsize = jnp.dtype(x.dtype).itemsize
    budget = _vmem_budget_bytes(block_b, chunk_b, M, in_itemsize)
    vmem_cap = (48 << 20) if gen == 7 else (96 << 20)           # v7x: 64 MiB physical / TC
    vmem_limit = int(min(vmem_cap, max(32 << 20, budget * 3 // 2 + (2 << 20))))

    kernel = functools.partial(_map_point_mlp_kernel, chunk_b=chunk_b)
    resident = pl.BlockSpec(memory_space=pltpu.MemorySpace.VMEM)  # whole array in VMEM

    out = pl.pallas_call(
        kernel,
        out_shape=jax.ShapeDtypeStruct((B, E), out_dtype),
        grid_spec=pltpu.PrefetchScalarGridSpec(
            num_scalar_prefetch=0,
            grid=(n_blocks,),
            in_specs=[
                pl.BlockSpec((block_b, M, D_in), lambda b: (b, 0, 0)),  # batch block
                resident,   # W1
                resident,   # b1
                resident,   # W2
                resident,   # b2
            ],
            out_specs=pl.BlockSpec((block_b, E), lambda b: (b, 0)),     # dense 2-D store
        ),
        compiler_params=pltpu.CompilerParams(
            dimension_semantics=("parallel",),   # batch blocks split across TCs on v7x
            vmem_limit_bytes=vmem_limit,
        ),
    )(x, w1c, b1_2d, w2c, b2_2d)

    additional_costs = {}
    return out.reshape(B, 1, E), additional_costs


def init_params(key, max_point_num=10, input_dim=3, embed_size=32):
    """Deterministic init mimicking nn.Linear defaults (uniform +/- 1/sqrt(fan_in))."""
    d_in = max_point_num * input_dim
    k1, k2, k3, k4 = jax.random.split(key, 4)
    bound1 = 1.0 / jnp.sqrt(d_in)
    bound2 = 1.0 / jnp.sqrt(embed_size)
    w1 = jax.random.uniform(k1, (d_in, embed_size), jnp.float32, -bound1, bound1)
    b1 = jax.random.uniform(k2, (embed_size,), jnp.float32, -bound1, bound1)
    w2 = jax.random.uniform(k3, (embed_size, embed_size), jnp.float32, -bound2, bound2)
    b2 = jax.random.uniform(k4, (embed_size,), jnp.float32, -bound2, bound2)
    return w1, b1, w2, b2


if __name__ == "__main__":
    key = jax.random.PRNGKey(0)
    kp1, kp2, kp3, kp4, kw, kw2 = jax.random.split(key, 6)

    # Shapes consistent with the module: num_map_elements=8,
    # num_points_per_element=max_point_num=10, input_dim=3, embed_size=32.
    M, P, DIM, E = 8, 10, 3, 32
    w1, b1, w2, b2 = init_params(kw, max_point_num=P, input_dim=DIM, embed_size=E)

    def reference(points, m, p, d):
        bsz = points.shape[0]
        xf = points.reshape(bsz * points.shape[1], p * d)
        h = jnp.maximum(xf @ w1 + b1, 0.0)
        h = jnp.maximum(h @ w2 + b2, 0.0)
        return jnp.max(h.reshape(bsz, points.shape[1], E), axis=1, keepdims=True)

    # Case 1: tiny batch (module example) -> single grid step, full-batch block.
    B1 = 2
    pts1 = jax.random.normal(kp1, (B1, M, P, DIM), dtype=jnp.float32)
    out1, costs = map_point_mlp_encoder(pts1, w1, b1, w2, b2)
    out1 = jax.block_until_ready(out1)
    assert out1.shape == (B1, 1, E)
    assert jnp.allclose(out1, reference(pts1, M, P, DIM), atol=1e-5, rtol=1e-5)
    assert costs == {}

    # Case 2: multi-step grid with a partial tail block (no wrapper padding).
    B2 = 13
    pts2 = jax.random.normal(kp2, (B2, M, P, DIM), dtype=jnp.float32)
    out2, _ = map_point_mlp_encoder(pts2, w1, b1, w2, b2, block_b=8)
    out2 = jax.block_until_ready(out2)
    assert out2.shape == (B2, 1, E)
    assert jnp.allclose(out2, reference(pts2, M, P, DIM), atol=1e-5, rtol=1e-5)

    # Case 3: large batch -> default generation-aware block, in-kernel chunking.
    B3 = 1040
    pts3 = jax.random.normal(kp3, (B3, M, P, DIM), dtype=jnp.float32)
    out3, _ = map_point_mlp_encoder(pts3, w1, b1, w2, b2)
    out3 = jax.block_until_ready(out3)
    assert out3.shape == (B3, 1, E)
    assert jnp.allclose(out3, reference(pts3, M, P, DIM), atol=2e-5, rtol=2e-5)

    # Case 4: bf16 MXU-operand path (f32 accumulate) — looser tolerance.
    out3b, _ = map_point_mlp_encoder(pts2, w1, b1, w2, b2, compute_dtype=jnp.bfloat16)
    out3b = jax.block_until_ready(out3b)
    assert out3b.shape == (B2, 1, E)
    assert jnp.allclose(out3b, reference(pts2, M, P, DIM), atol=6e-2, rtol=6e-2)

    # Case 5: M not a multiple of 8 -> wrapper edge-pads M (max unchanged).
    M2, B5 = 6, 4
    w1b, b1b, w2b, b2b = init_params(kw2, max_point_num=P, input_dim=DIM, embed_size=E)
    pts5 = jax.random.normal(kp4, (B5, M2, P, DIM), dtype=jnp.float32)
    xf5 = pts5.reshape(B5 * M2, P * DIM)
    h5 = jnp.maximum(xf5 @ w1b + b1b, 0.0)
    h5 = jnp.maximum(h5 @ w2b + b2b, 0.0)
    ref5 = jnp.max(h5.reshape(B5, M2, E), axis=1, keepdims=True)
    out5, _ = map_point_mlp_encoder(pts5, w1b, b1b, w2b, b2b)
    out5 = jax.block_until_ready(out5)
    assert out5.shape == (B5, 1, E)
    assert jnp.allclose(out5, ref5, atol=1e-5, rtol=1e-5)

    print("KERNEL_OK")
</pallas_src>

<mosaic_0001>
module attributes {stable_mosaic.version = 11 : i64} {
  func.func @_map_point_mlp_kernel(%arg0: i32, %arg1: memref<2x8x30xf32, #tpu.memory_space<vmem>>, %arg2: memref<30x32xf32, #tpu.memory_space<vmem>>, %arg3: memref<1x32xf32, #tpu.memory_space<vmem>>, %arg4: memref<32x32xf32, #tpu.memory_space<vmem>>, %arg5: memref<1x32xf32, #tpu.memory_space<vmem>>, %arg6: memref<2x32xf32, #tpu.memory_space<vmem>>) attributes {dimension_semantics = [#tpu.dimension_semantics<parallel>], iteration_bounds = array<i64: 1>, scalar_prefetch = 0 : i64, scratch_operands = 0 : i64, tpu.core_type = #tpu.core_type<tc>, window_params = [{transform_indices = @transform_0, window_bounds = array<i64: 2, 8, 30>}, {pipeline_mode = #tpu.pipeline_mode<synchronous>, transform_indices = @transform_1, window_bounds = array<i64: 30, 32>}, {pipeline_mode = #tpu.pipeline_mode<synchronous>, transform_indices = @transform_2, window_bounds = array<i64: 1, 32>}, {pipeline_mode = #tpu.pipeline_mode<synchronous>, transform_indices = @transform_3, window_bounds = array<i64: 32, 32>}, {pipeline_mode = #tpu.pipeline_mode<synchronous>, transform_indices = @transform_4, window_bounds = array<i64: 1, 32>}, {transform_indices = @transform_5, window_bounds = array<i64: 2, 32>}]} {
    %c0 = arith.constant 0 : index
    %c0_0 = arith.constant 0 : index
    %0 = vector.load %arg2[%c0, %c0_0] : memref<30x32xf32, #tpu.memory_space<vmem>>, vector<30x32xf32>
    %c0_1 = arith.constant 0 : index
    %c0_2 = arith.constant 0 : index
    %1 = vector.load %arg3[%c0_1, %c0_2] : memref<1x32xf32, #tpu.memory_space<vmem>>, vector<1x32xf32>
    %c0_3 = arith.constant 0 : index
    %c0_4 = arith.constant 0 : index
    %2 = vector.load %arg4[%c0_3, %c0_4] : memref<32x32xf32, #tpu.memory_space<vmem>>, vector<32x32xf32>
    %c0_5 = arith.constant 0 : index
    %c0_6 = arith.constant 0 : index
    %3 = vector.load %arg5[%c0_5, %c0_6] : memref<1x32xf32, #tpu.memory_space<vmem>>, vector<1x32xf32>
    %c0_7 = arith.constant 0 : index
    %c0_8 = arith.constant 0 : index
    %c0_9 = arith.constant 0 : index
    %4 = vector.load %arg1[%c0_7, %c0_8, %c0_9] : memref<2x8x30xf32, #tpu.memory_space<vmem>>, vector<2x8x30xf32>
    %5 = vector.shape_cast %4 : vector<2x8x30xf32> to vector<16x30xf32>
    %cst = arith.constant dense<0.000000e+00> : vector<16x32xf32>
    %6 = tpu.matmul %5, %0, %cst {dimension_numbers = #tpu.dot_dimension_numbers<[1], [0], [0], [1], [0, 0, 1, 1], [], []>} : vector<16x30xf32>, vector<30x32xf32>, vector<16x32xf32> -> vector<16x32xf32>
    %7 = vector.broadcast %1 : vector<1x32xf32> to vector<16x32xf32>
    %8 = arith.addf %6, %7 : vector<16x32xf32>
    %cst_10 = arith.constant 0.000000e+00 : f32
    %9 = vector.broadcast %cst_10 : f32 to vector<16x32xf32>
    %10 = arith.maximumf %8, %9 : vector<16x32xf32>
    %cst_11 = arith.constant dense<0.000000e+00> : vector<16x32xf32>
    %11 = tpu.matmul %10, %2, %cst_11 {dimension_numbers = #tpu.dot_dimension_numbers<[1], [0], [0], [1], [0, 0, 1, 1], [], []>} : vector<16x32xf32>, vector<32x32xf32>, vector<16x32xf32> -> vector<16x32xf32>
    %12 = vector.broadcast %3 : vector<1x32xf32> to vector<16x32xf32>
    %13 = arith.addf %11, %12 : vector<16x32xf32>
    %cst_12 = arith.constant 0.000000e+00 : f32
    %14 = vector.broadcast %cst_12 : f32 to vector<16x32xf32>
    %15 = arith.maximumf %13, %14 : vector<16x32xf32>
    %16 = vector.shape_cast %15 : vector<16x32xf32> to vector<2x8x32xf32>
    %cst_13 = arith.constant dense<0xFF800000> : vector<2x32xf32>
    %17 = vector.multi_reduction <maximumf>, %16, %cst_13 [1] : vector<2x8x32xf32> to vector<2x32xf32>
    %c0_14 = arith.constant 0 : index
    %c0_15 = arith.constant 0 : index
    %18 = vector.load %arg6[%c0_14, %c0_15] : memref<2x32xf32, #tpu.memory_space<vmem>>, vector<2x32xf32>
    tpu.vector_store %arg6[%c0_14, %c0_15], %17 {strides = array<i32>} : memref<2x32xf32, #tpu.memory_space<vmem>>, vector<2x32xf32>,
    return
  }
  func.func @transform_0(%arg0: i32) -> (i32, i32, i32) {
    %c0_i32 = arith.constant 0 : i32
    %c0_i32_0 = arith.constant 0 : i32
    %c0_i32_1 = arith.constant 0 : i32
    return %arg0, %c0_i32, %c0_i32_0 : i32, i32, i32
  }
  func.func @transform_1(%arg0: i32) -> (i32, i32) {
    %c0_i32 = arith.constant 0 : i32
    %c0_i32_0 = arith.constant 0 : i32
    %c0_i32_1 = arith.constant 0 : i32
    return %c0_i32, %c0_i32_0 : i32, i32
  }
  func.func @transform_2(%arg0: i32) -> (i32, i32) {
    %c0_i32 = arith.constant 0 : i32
    %c0_i32_0 = arith.constant 0 : i32
    %c0_i32_1 = arith.constant 0 : i32
    return %c0_i32, %c0_i32_0 : i32, i32
  }
  func.func @transform_3(%arg0: i32) -> (i32, i32) {
    %c0_i32 = arith.constant 0 : i32
    %c0_i32_0 = arith.constant 0 : i32
    %c0_i32_1 = arith.constant 0 : i32
    return %c0_i32, %c0_i32_0 : i32, i32
  }
  func.func @transform_4(%arg0: i32) -> (i32, i32) {
    %c0_i32 = arith.constant 0 : i32
    %c0_i32_0 = arith.constant 0 : i32
    %c0_i32_1 = arith.constant 0 : i32
    return %c0_i32, %c0_i32_0 : i32, i32
  }
  func.func @transform_5(%arg0: i32) -> (i32, i32) {
    %c0_i32 = arith.constant 0 : i32
    %c0_i32_0 = arith.constant 0 : i32
    return %arg0, %c0_i32 : i32, i32
  }
}

</mosaic_0001>

<bundles_post_ra>
// kernel: tpu_custom_call.1
= control target key start
LH: loop header
LB: loop body
LE: loop exit
PB: predicated region body
PF: predicated region fallthrough
CT: control target
= control target key end

     0   :  { %10 = vsyncpa [#allocation3], 0  ;;  %s564_s0 = inlined_call_operand.hbm [shape: f32[2,8,30], index: 0, kind: input, shape index: {}]   ;;  %s565_s1 = inlined_call_operand.hbm [shape: f32[30,32], index: 1, kind: input, shape index: {}]   ;;  %s566_s2 = inlined_call_operand.vmem [shape: f32[1,32], index: 2, kind: input, shape index: {}]   ;;  %s567_s3 = inlined_call_operand.hbm [shape: f32[32,32], index: 3, kind: input, shape index: {}]   ;;  %s568_s4 = inlined_call_operand.vmem [shape: f32[1,32], index: 4, kind: input, shape index: {}]   ;;  %s569_s5 = inlined_call_operand.hbm [shape: f32[2,32], index: 5, kind: output, shape index: {}]  }
   0x1   :  { %11 = vsyncpa [#allocation6], 0 }
   0x2   :  { %12 = vsyncpa [#allocation4], 0  ;;  %s455_s18 = smov [#allocation5]   ;;  %s456_s20 = smov [#allocation2]  }
   0x3   :  { %s30_s19 = sshll.u32 %s455_s18, 4  ;;  %s18_s21 = sshll.u32 %s456_s20, 4  ;;  %s31_s19 = int_to_ptr.vmem [resolvable:$true] %s30_s19  ;;  %s492_s21 = int_to_ptr.vmem [resolvable:$true] %s18_s21 }
   0x4   :  { %s361_s24 = scalar_lea.hbm %s565_s1, 512 }
   0x5   :  { %p362_p0 = scmp.ne.s32.totalorder %s565_s1, %s361_s24  ;;  %p365_p1 = scmp.lt.u32.totalorder %s361_s24, %s565_s1 }
   0x7   :  { %p367_p2 = pnand %p365_p1, %p362_p0 }
   0x9   :  { %370 = shalt.err (!%p367_p2)
}
   0xa   :  { %s371_s29 = scalar_lea.vmem %s31_s19, 512  ;;  %p376_p4 = scmp.lt.s32.totalorder %s31_s19, %s31_s19 }
   0xb   :  { %p372_p3 = scmp.ne.s32.totalorder %s31_s19, %s371_s29  ;;  %p377_p5 = scmp.lt.s32.totalorder %s371_s29, %s371_s29 }
   0xd   :  { %p378_p6 = por %p377_p5, %p376_p4 }
   0xf   :  { %p379_p7 = pnand %p378_p6, %p372_p3 }
  0x11   :  { %382 = shalt.err (!%p379_p7)
}
  0x12   :  { %s457_s30 = smov 128   ;;  %s458_s6 = smov 8  }
  0x13   :  { %36 = dma.hbm_to_vmem [thread:$0]  %s565_s1, 512, %s31_s19, [#allocation6], %s457_s30, %s457_s30, %s458_s6  }
  0x14   :  { %s383_s11 = scalar_lea.hbm %s564_s0, 256 }
  0x15   :  { %p384_p8 = scmp.ne.s32.totalorder %s564_s0, %s383_s11  ;;  %p387_p9 = scmp.lt.u32.totalorder %s383_s11, %s564_s0 }
  0x17   :  { %p389_p10 = pnand %p387_p9, %p384_p8 }
  0x19   :  { %392 = shalt.err (!%p389_p10)
}
  0x1a   :  { %s393_s16 = scalar_lea.vmem %s492_s21, 256  ;;  %p398_p12 = scmp.lt.s32.totalorder %s492_s21, %s492_s21 }
  0x1b   :  { %p394_p11 = scmp.ne.s32.totalorder %s492_s21, %s393_s16  ;;  %p399_p13 = scmp.lt.s32.totalorder %s393_s16, %s393_s16 }
  0x1d   :  { %p400_p0 = por %p399_p13, %p398_p12 }
  0x1f   :  { %p401_p1 = pnand %p400_p0, %p394_p11 }
  0x21   :  { %404 = shalt.err (!%p401_p1)
}
  0x22   :  { %24 = dma.hbm_to_vmem [thread:$0]  %s564_s0, 256, %s492_s21, [#allocation3], %s457_s30, %s457_s30, %s458_s6  }
  0x23   :  { %s459_s18 = smov [#allocation7]   ;;  %s405_s23 = scalar_lea.hbm %s567_s3, 512 }
  0x24   :  { %s44_s19 = sshll.u32 %s459_s18, 4  ;;  %p406_p2 = scmp.ne.s32.totalorder %s567_s3, %s405_s23  ;;  %s45_s19 = int_to_ptr.vmem [resolvable:$true] %s44_s19 }
  0x25   :  { %p409_p3 = scmp.lt.u32.totalorder %s405_s23, %s567_s3 }
  0x27   :  { %p411_p4 = pnand %p409_p3, %p406_p2 }
  0x29   :  { %414 = shalt.err (!%p411_p4)
}
  0x2a   :  { %s415_s28 = scalar_lea.vmem %s45_s19, 512  ;;  %p420_p6 = scmp.lt.s32.totalorder %s45_s19, %s45_s19 }
  0x2b   :  { %p416_p5 = scmp.ne.s32.totalorder %s45_s19, %s415_s28  ;;  %p421_p7 = scmp.lt.s32.totalorder %s415_s28, %s415_s28 }
  0x2d   :  { %p422_p8 = por %p421_p7, %p420_p6 }
  0x2f   :  { %p423_p9 = pnand %p422_p8, %p416_p5 }
  0x31   :  { %426 = shalt.err (!%p423_p9)
}
  0x32   :  { %50 = dma.hbm_to_vmem [thread:$0]  %s567_s3, 512, %s45_s19, [#allocation6], %s457_s30, %s457_s30, %s458_s6  }
  0x33   :  { %449 = dma.done.wait [#allocation3], 256  }
  0x34   :  { %450 = vsyncadd [#allocation3], 4294967040 }
  0x35   :  { %451 = dma.done.wait [#allocation6], 1024  }
  0x36   :  { %452 = vsyncadd [#allocation6], 4294966272  ;;  %vm87_vm0 = vcmask 1045504   ;;  %vm80_vm1 = vcmask 244736   ;;  %v62_v0 = vld [vmem:[#allocation5] sm:$0xff]  ;;  %v63_v1 = vld [vmem:[#allocation5 + $0x8] sm:$0xff] }
  0x37   :  { %v64_v2 = vld [vmem:[#allocation5 + $0x10] sm:$0xff]  ;;  %v336_v3 = vpack.c.bf16 %v63_v1, %v62_v0  ;;  %v65_v4 = vld [vmem:[#allocation5 + $0x18] sm:$0x3f]  ;;  %vm460_vm2 = vmmov 1   ;;  %v67_v7 = vld [vmem:[#allocation7] sm:$0xff]  ;;  %vm174_vm4 = vcmask 261120  }
  0x38   :  { %v72_v5 = vld [vmem:[#allocation2] sm:$0xff]  ;;  %v340_v6 = vpack.c.bf16 %v65_v4, %v64_v2  ;;  %vm341_vm3 = vmpackc.low %vm87_vm0, %vm460_vm2  ;;  %v68_v8 = vld [vmem:[#allocation7 + $0x8] sm:$0xff]  ;;  %vm274_vm5 = vcmask 1041409   ;;  %vm277_vm6 = vcmask 254976  }
  0x39   :  { %322 = vmatprep.mubr.msk.f32.mxu0 %vm80_vm1, %v72_v5  ;;  %337 = vmatprep.subr.bf16.mxu0 %v336_v3  ;;  %v346_v9 = vpack.c.bf16 %v68_v8, %v67_v7  ;;  %v73_v10 = vld [vmem:[#allocation2 + $0x8] sm:$0xff]  ;;  %v69_v11 = vld [vmem:[#allocation7 + $0x10] sm:$0xff] }
  0x3a   :  { %339 = vmatpush3.bf16.msra.mxu0 %v336_v3  ;;  %v70_v12 = vld [vmem:[#allocation7 + $0x18] sm:$0xff]  ;;  %v295_v14 = vld [vmem:[%s566_s2] ss:$0 sm:$0xff]  ;;  %s461_s2 = smov [#allocation8]  }
  0x3b   :  { %342 = vmatprep.subr.msk.bf16.mxu0 %vm341_vm3, %v340_v6  ;;  %347 = vmatprep.subr.bf16.mxu1 %v346_v9  ;;  %v350_v13 = vpack.c.bf16 %v70_v12, %v69_v11  ;;  %v299_v21 = vld [vmem:[%s568_s4] ss:$0 sm:$0xff]  ;;  %s285_s4 = sshll.u32 %s461_s2, 4  ;;  %s286_s4 = int_to_ptr.vmem [resolvable:$true] %s285_s4 }
  0x3c   :  { %349 = vmatpush3.bf16.msra.mxu1 %v346_v9  ;;  %s427_s7 = scalar_lea.vmem %s286_s4, 32  ;;  %p432_p11 = scmp.lt.s32.totalorder %s286_s4, %s286_s4 }
  0x3d   :  { %351 = vmatprep.subr.bf16.mxu1 %v350_v13  ;;  %p428_p10 = scmp.ne.s32.totalorder %s286_s4, %s427_s7  ;;  %p433_p12 = scmp.lt.s32.totalorder %s427_s7, %s427_s7 }
  0x3e   :  { %345 = vmatpush3.bf16.msk.msra.mxu0 %vm341_vm3, %v340_v6 }
  0x3f   :  { %p434_p13 = por %p433_p12, %p432_p11 }
  0x40   :  { %353 = vmatpush3.bf16.msra.mxu1 %v350_v13 }
  0x41   :  { %323 = vmatmul.mubr.msk.f32.vlgmr.msra.gmra.mrb[0].mxu0 %vm80_vm1, %v73_v10  ;;  %p435_p0 = pnand %p434_p13, %p428_p10 }
 0x114   :  { %v324_v15 = vpop.f32.mrb[0].mxu0 }
 0x115   :  { %v163_v16 = vadd.f32 %v324_v15, %v295_v14  ;;  %v157_v17 = vpop.f32.mrb[1].mxu0 }
 0x116   :  { %v158_v18 = vadd.f32 %v295_v14, %v157_v17 }
 0x117   :  { %v167_v20 = vmax.f32 %v163_v16, 0.0 }
 0x118   :  { %v166_v19 = vmax.f32 %v158_v18, 0.0 }
 0x11a   :  { %333 = vmatprep.mubr.msk.f32.mxu1 %vm174_vm4, %v166_v19 }
 0x11b   :  { %334 = vmatmul.mubr.msk.f32.vlgmr.msra.gmra.mrb[0].mxu1 %vm174_vm4, %v167_v20 }
 0x1ee   :  { %v335_v22 = vpop.f32.mrb[0].mxu1 }
 0x1ef   :  { %v253_v23 = vadd.f32 %v335_v22, %v299_v21  ;;  %v247_v24 = vpop.f32.mrb[1].mxu1 }
 0x1f0   :  { %v248_v25 = vadd.f32 %v299_v21, %v247_v24 }
 0x1f1   :  { %v257_v26 = vmax.f32 %v253_v23, 0.0 }
 0x1f2   :  { %v256_v27 = vmax.f32 %v248_v25, 0.0 }
 0x1f3   :  { %v265_v28 = vsel %vm174_vm4, %v257_v26, -inf }
 0x1f4   :  { %v266_v29 = vrot.slane %v265_v28, 4  ;;  %v258_v30 = vsel %vm174_vm4, %v256_v27, -inf }
 0x1f5   :  { %v259_v31 = vrot.slane %v258_v30, 4 }
 0x1f6   :  { %v267_v32 = vmax.f32 %v265_v28, %v266_v29 }
 0x1f7   :  { %v260_v33 = vmax.f32 %v258_v30, %v259_v31 }
 0x1f8   :  { %v268_v34 = vrot.slane %v267_v32, 2 }
 0x1f9   :  { %v261_v35 = vrot.slane %v260_v33, 2 }
 0x1fa   :  { %v269_v36 = vmax.f32 %v267_v32, %v268_v34 }
 0x1fb   :  { %v262_v37 = vmax.f32 %v260_v33, %v261_v35 }
 0x1fc   :  { %v270_v38 = vrot.slane %v269_v36, 1 }
 0x1fd   :  { %v263_v39 = vrot.slane %v262_v37, 1 }
 0x1fe   :  { %v271_v40 = vmax.f32 %v269_v36, %v270_v38 }
 0x1ff   :  { %v264_v41 = vmax.f32 %v262_v37, %v263_v39 }
 0x201   :  { %v275_v42 = vsel %vm274_vm5, %v271_v40, %v264_v41 }
 0x202   :  { %278 = vst.msk [vmem:[#allocation8] sm:$0x3] %vm277_vm6, %v275_v42 }
 0x203   :  { %438 = shalt.err (!%p435_p0)
}
 0x204   :  { %s439_s10 = scalar_lea.hbm %s569_s5, 32 }
 0x205   :  { %p440_p1 = scmp.ne.s32.totalorder %s569_s5, %s439_s10  ;;  %p443_p2 = scmp.lt.u32.totalorder %s439_s10, %s569_s5 }
 0x207   :  { %p445_p3 = pnand %p443_p2, %p440_p1 }
 0x209   :  { %448 = shalt.err (!%p445_p3)
}
 0x20a   :  { %288 = dma.vmem_to_hbm [thread:$0]  %s286_s4, 32, %s569_s5, [#allocation4]  }
 0x20b   :  { %453 = dma.done.wait [#allocation4], 32  }
 0x20c   :  { %454 = vsyncadd [#allocation4], 4294967264 }
 0x20d   :  { %292 = vsyncpa [#allocation3], 1 }
 0x20e   :  { %293 = vsyncpa [#allocation6], 1 }
 0x20f   :  { %294 = vsyncpa [#allocation4], 1 }

</bundles_post_ra>
